<compile_context>
chip_gen: v7x
topology: tpu7x:2x2x1
jax: 0.10.0
libtpu: 0.0.40
codegen_flags: <defaults>
</compile_context>

<pallas_src>
import functools

import jax
import jax.numpy as jnp
from jax.experimental import pallas as pl
from jax.experimental.pallas import tpu as pltpu

LN_EPS = 1e-12
_MIB = 1024 * 1024


def _round_up(x, m):
    return ((x + m - 1) // m) * m


def _vmem_capacity_bytes():
    try:
        return int(pltpu.get_tpu_info().vmem_capacity_bytes)
    except Exception:
        return 64 * _MIB  # conservative (v7x per-TC VMEM)


def _single_buffered_spec(block_shape, index_map):
    """Constant-index operand: revisited every step, nothing to overlap ->
    single-buffer it so it doesn't pay 2x VMEM."""
    try:
        return pl.BlockSpec(block_shape, index_map, pipeline_mode=pl.Buffered(1))
    except Exception:  # older jax without pipeline_mode / Buffered
        return pl.BlockSpec(block_shape, index_map)


def _layernorm_epilogue(y, g_ref, be_ref, o_ref, hidden_size):
    # One-pass statistics: sum(y), sum(y*y). Padded H columns of y are exactly
    # zero (zero-padded weight / bias / residual), so divide by the TRUE hidden
    # size. NOTE: E[y^2]-E[y]^2 is slightly more cancellation-prone than the
    # centered two-pass form; fine at f32 for these magnitudes.
    inv_h = jnp.float32(1.0 / hidden_size)
    sum_y = jnp.sum(y, axis=-1, keepdims=True)
    sum_yy = jnp.sum(y * y, axis=-1, keepdims=True)
    mean = sum_y * inv_h
    var = jnp.maximum(sum_yy * inv_h - mean * mean, 0.0)   # biased variance
    inv_std = jax.lax.rsqrt(var + LN_EPS)                   # EUP slot, ~free
    shift = -mean * inv_std                                 # per-row scalar work
    # only two vector passes over y: (y * inv_std + shift), then scale/shift by params
    o_ref[...] = (g_ref[...] * (y * inv_std + shift) + be_ref[...]).astype(o_ref.dtype)


def _fused_kernel(x_ref, w_ref, b_ref, res_ref, g_ref, be_ref, o_ref, *, hidden_size):
    """Resident-weight path: one MXU matmul per row tile + bias + residual + LN."""
    x = x_ref[...]
    if x.dtype != w_ref.dtype:
        x = x.astype(w_ref.dtype)          # cast in VMEM, not in the wrapper
    y = jnp.dot(x, w_ref[...], preferred_element_type=jnp.float32)
    y = y + b_ref[...] + res_ref[...].astype(jnp.float32)
    _layernorm_epilogue(y, g_ref, be_ref, o_ref, hidden_size)


def _ksplit_kernel(x_ref, w_ref, b_ref, res_ref, g_ref, be_ref, o_ref, acc_ref, *,
                   hidden_size):
    """Streamed-weight path: K grid axis, f32 VMEM accumulator, LN at last K step."""
    k = pl.program_id(1)

    @pl.when(k == 0)
    def _():
        acc_ref[...] = jnp.zeros_like(acc_ref)

    x = x_ref[...]
    if x.dtype != w_ref.dtype:
        x = x.astype(w_ref.dtype)
    acc_ref[...] += jnp.dot(x, w_ref[...], preferred_element_type=jnp.float32)

    @pl.when(k == pl.num_programs(1) - 1)
    def _():
        y = acc_ref[...] + b_ref[...] + res_ref[...].astype(jnp.float32)
        _layernorm_epilogue(y, g_ref, be_ref, o_ref, hidden_size)


def prepare_params(w, b, gamma, beta, *, matmul_dtype=jnp.bfloat16):
    """One-time parameter prep (dtype cast + lane padding). Call once, reuse —
    the weight cast/pad is NOT re-executed per forward call."""
    I, H = w.shape
    H_pad = _round_up(H, 128)
    wm = w if matmul_dtype is None else w.astype(matmul_dtype)
    if H_pad != H:
        wm = jnp.pad(wm, ((0, 0), (0, H_pad - H)))

    def prep_vec(v):
        v = v.astype(jnp.float32)
        if H_pad != H:
            v = jnp.pad(v, (0, H_pad - H))
        return v.reshape(1, H_pad)

    return dict(w=wm, b=prep_vec(b), gamma=prep_vec(gamma), beta=prep_vec(beta),
                hidden_size=H)


@functools.partial(
    jax.jit,
    static_argnames=("hidden_size", "tm", "k_block", "out_dtype",
                     "max_resident_weight_bytes"))
def _output_forward_impl(x, res, wm, b2, g2, be2, *, hidden_size, tm, k_block,
                         out_dtype, max_resident_weight_bytes):
    M, I = x.shape
    H = hidden_size
    Iw, H_pad = wm.shape
    if Iw != I:
        raise ValueError("weight/activation intermediate-size mismatch")
    out_dtype = jnp.dtype(x.dtype if out_dtype is None else out_dtype)

    # Residual lane padding only when H is not already a multiple of 128
    # (no-op for BERT/LLM sizes, so no extra HBM pass there).
    if res.shape[-1] != H_pad:
        res = jnp.pad(res, ((0, 0), (0, H_pad - res.shape[-1])))

    # --- row tiling: never pad/copy activations along M ---------------------
    row_align = 8 if (x.dtype.itemsize >= 4 and out_dtype.itemsize >= 4) else 16
    # keep >= 2 row tiles so both v7x TensorCores get work
    tm_eff = max(row_align, min(tm, _round_up(pl.cdiv(M, 2), row_align)))
    grid_m = pl.cdiv(M, tm_eff)

    vmem_cap = _vmem_capacity_bytes()
    w_bytes = wm.size * wm.dtype.itemsize

    # --- resident weight vs K-split (streamed weight) ------------------------
    tk = None
    if k_block is not None and I % k_block == 0 and k_block % 128 == 0 and k_block <= I:
        tk = k_block
    else:
        budget = (max_resident_weight_bytes if max_resident_weight_bytes is not None
                  else vmem_cap // 3)
        if w_bytes > budget:
            for cand in (2048, 1536, 1024, 768, 512, 384, 256, 128):
                if I % cand == 0 and cand < I:
                    tk = cand
                    break
            # if I has no suitable 128-multiple divisor, fall back to resident

    # --- VMEM budget from the actual buffer plan ------------------------------
    x_it, r_it, o_it = x.dtype.itemsize, res.dtype.itemsize, out_dtype.itemsize
    param_bytes = 3 * H_pad * 4                       # bias/gamma/beta, single-buffered
    row_io = 2 * tm_eff * H_pad * (r_it + o_it)       # double-buffered res + out
    epi_scratch = 3 * tm_eff * H_pad * 4              # y + epilogue temporaries headroom
    if tk is None:
        plan = 2 * tm_eff * I * x_it + w_bytes + param_bytes + row_io + epi_scratch
    else:
        plan = (2 * tm_eff * tk * x_it + 2 * tk * H_pad * wm.dtype.itemsize
                + param_bytes + row_io + tm_eff * H_pad * 4 + epi_scratch)
    vmem_limit = int(max(32 * _MIB, min(vmem_cap - 8 * _MIB, plan + 16 * _MIB)))

    cost = pl.CostEstimate(
        flops=2 * M * I * H_pad,
        transcendentals=M,
        bytes_accessed=int(x.size * x_it + w_bytes + res.size * r_it
                           + param_bytes + M * H_pad * o_it))

    out_shape = jax.ShapeDtypeStruct((M, H_pad), out_dtype)

    if tk is None:
        grid = (grid_m,)
        in_specs = [
            pl.BlockSpec((tm_eff, I), lambda i: (i, 0)),              # activations
            _single_buffered_spec((I, H_pad), lambda i: (0, 0)),      # weight (resident)
            _single_buffered_spec((1, H_pad), lambda i: (0, 0)),      # bias (f32)
            pl.BlockSpec((tm_eff, H_pad), lambda i: (i, 0)),          # residual
            _single_buffered_spec((1, H_pad), lambda i: (0, 0)),      # gamma
            _single_buffered_spec((1, H_pad), lambda i: (0, 0)),      # beta
        ]
        out_specs = pl.BlockSpec((tm_eff, H_pad), lambda i: (i, 0))
        scratch_shapes = []
        kernel = functools.partial(_fused_kernel, hidden_size=H)
        dims = ("parallel",)
    else:
        grid = (grid_m, I // tk)
        in_specs = [
            pl.BlockSpec((tm_eff, tk), lambda i, k: (i, k)),          # activations
            pl.BlockSpec((tk, H_pad), lambda i, k: (k, 0)),           # streamed weight
            _single_buffered_spec((1, H_pad), lambda i, k: (0, 0)),   # bias
            pl.BlockSpec((tm_eff, H_pad), lambda i, k: (i, 0)),       # residual
            _single_buffered_spec((1, H_pad), lambda i, k: (0, 0)),   # gamma
            _single_buffered_spec((1, H_pad), lambda i, k: (0, 0)),   # beta
        ]
        out_specs = pl.BlockSpec((tm_eff, H_pad), lambda i, k: (i, 0))
        scratch_shapes = [pltpu.VMEM((tm_eff, H_pad), jnp.float32)]
        kernel = functools.partial(_ksplit_kernel, hidden_size=H)
        dims = ("parallel", "arbitrary")

    out = pl.pallas_call(
        kernel,
        out_shape=out_shape,
        grid_spec=pltpu.PrefetchScalarGridSpec(
            num_scalar_prefetch=0,
            grid=grid,
            in_specs=in_specs,
            out_specs=out_specs,
            scratch_shapes=scratch_shapes),
        compiler_params=pltpu.CompilerParams(
            dimension_semantics=dims,
            vmem_limit_bytes=vmem_limit),
        cost_estimate=cost,
    )(x, wm, b2, res, g2, be2)

    if H_pad != H:
        out = out[:, :H]
    return out


def output_forward(hidden_states, input_tensor, params, *, tm=512, k_block=None,
                   out_dtype=None, max_resident_weight_bytes=None):
    """Fused Linear + (dropout=identity) + residual add + LayerNorm.

    hidden_states: (M, I)  tokens x intermediate_size
    input_tensor : (M, H)  tokens x hidden_size (residual)
    params       : output of prepare_params (pre-cast / pre-padded weight & LN params)
    """
    # TODO(synk): training-mode dropout (RNG mask) not implemented; identity at inference.
    return _output_forward_impl(
        hidden_states, input_tensor,
        params["w"], params["b"], params["gamma"], params["beta"],
        hidden_size=params["hidden_size"], tm=tm, k_block=k_block,
        out_dtype=out_dtype, max_resident_weight_bytes=max_resident_weight_bytes)


def reference(hidden_states, input_tensor, w, b, gamma, beta):
    y = hidden_states @ w + b + input_tensor
    u = jnp.mean(y, axis=-1, keepdims=True)
    s = jnp.mean((y - u) ** 2, axis=-1, keepdims=True)
    yn = (y - u) / jnp.sqrt(s + LN_EPS)
    return gamma * yn + beta


if __name__ == "__main__":
    # small shapes implied by the module: batch=2, seq=8, intermediate=64, hidden=32
    B, S, I, H = 2, 8, 64, 32
    key = jax.random.PRNGKey(0)
    k1, k2, k3, k4 = jax.random.split(key, 4)

    hidden_states = jax.random.normal(k1, (B, S, I), dtype=jnp.float32)
    input_tensor = jax.random.normal(k2, (B, S, H), dtype=jnp.float32)

    # deterministic parameter init (synthetic; matches nn.Linear + LayerNorm shapes)
    w = jax.random.normal(k3, (I, H), dtype=jnp.float32) * (1.0 / jnp.sqrt(I))
    b = jax.random.normal(k4, (H,), dtype=jnp.float32) * 0.02
    gamma = jnp.ones((H,), dtype=jnp.float32)
    beta = jnp.zeros((H,), dtype=jnp.float32)

    hs2d = hidden_states.reshape(B * S, I)
    res2d = input_tensor.reshape(B * S, H)
    ref = reference(hs2d, res2d, w, b, gamma, beta)

    # 1) Default fast path: bf16 weight (prepared once), x cast to bf16 inside the
    #    kernel, f32 accumulation + f32 LayerNorm math, resident-weight kernel.
    params_bf16 = prepare_params(w, b, gamma, beta, matmul_dtype=jnp.bfloat16)
    out_bf16 = jax.block_until_ready(output_forward(hs2d, res2d, params_bf16))
    assert out_bf16.shape == (B * S, H)
    assert jnp.allclose(out_bf16, ref, atol=5e-2, rtol=5e-2), float(
        jnp.max(jnp.abs(out_bf16 - ref)))

    # 2) Full-f32 path; also exercises the partial last row tile
    #    (M = 21 rows, row tile 16 -> masked stores on the overhang).
    Bm, Sm = 3, 7
    hs_r = jax.random.normal(k1, (Bm * Sm, I), dtype=jnp.float32)
    res_r = jax.random.normal(k2, (Bm * Sm, H), dtype=jnp.float32)
    params_f32 = prepare_params(w, b, gamma, beta, matmul_dtype=None)
    out_f32 = jax.block_until_ready(output_forward(hs_r, res_r, params_f32))
    ref_r = reference(hs_r, res_r, w, b, gamma, beta)
    assert jnp.allclose(out_f32, ref_r, atol=2e-2, rtol=2e-2), float(
        jnp.max(jnp.abs(out_f32 - ref_r)))

    # 3) K-split path (streamed weight blocks + f32 VMEM accumulator, LN at last K),
    #    forced here with k_block=128; selected automatically for weights that don't
    #    fit resident in VMEM (e.g. large layers on v7x's 64 MiB).
    I2, H2, M2 = 256, 128, 40
    kk = jax.random.split(jax.random.PRNGKey(1), 4)
    hs_k = jax.random.normal(kk[0], (M2, I2), dtype=jnp.float32)
    res_k = jax.random.normal(kk[1], (M2, H2), dtype=jnp.float32)
    w_k = jax.random.normal(kk[2], (I2, H2), dtype=jnp.float32) * (1.0 / jnp.sqrt(I2))
    b_k = jax.random.normal(kk[3], (H2,), dtype=jnp.float32) * 0.02
    g_k = jnp.ones((H2,), jnp.float32)
    be_k = jnp.zeros((H2,), jnp.float32)
    params_k = prepare_params(w_k, b_k, g_k, be_k, matmul_dtype=jnp.bfloat16)
    out_k = jax.block_until_ready(output_forward(hs_k, res_k, params_k, k_block=128))
    ref_k = reference(hs_k, res_k, w_k, b_k, g_k, be_k)
    assert jnp.allclose(out_k, ref_k, atol=5e-2, rtol=5e-2), float(
        jnp.max(jnp.abs(out_k - ref_k)))

    print("KERNEL_OK")
</pallas_src>

<mosaic_0001>
module attributes {stable_mosaic.version = 11 : i64} {
  func.func @_fused_kernel(%arg0: i32, %arg1: memref<8x64xf32, #tpu.memory_space<vmem>>, %arg2: memref<64x128xbf16, #tpu.memory_space<vmem>>, %arg3: memref<1x128xf32, #tpu.memory_space<vmem>>, %arg4: memref<8x128xf32, #tpu.memory_space<vmem>>, %arg5: memref<1x128xf32, #tpu.memory_space<vmem>>, %arg6: memref<1x128xf32, #tpu.memory_space<vmem>>, %arg7: memref<8x128xf32, #tpu.memory_space<vmem>>) attributes {dimension_semantics = [#tpu.dimension_semantics<parallel>], iteration_bounds = array<i64: 2>, scalar_prefetch = 0 : i64, scratch_operands = 0 : i64, tpu.core_type = #tpu.core_type<tc>, window_params = [{transform_indices = @transform_0, window_bounds = array<i64: 8, 64>}, {pipeline_mode = #tpu.pipeline_mode<synchronous>, transform_indices = @transform_1, window_bounds = array<i64: 64, 128>}, {pipeline_mode = #tpu.pipeline_mode<synchronous>, transform_indices = @transform_2, window_bounds = array<i64: 1, 128>}, {transform_indices = @transform_3, window_bounds = array<i64: 8, 128>}, {pipeline_mode = #tpu.pipeline_mode<synchronous>, transform_indices = @transform_4, window_bounds = array<i64: 1, 128>}, {pipeline_mode = #tpu.pipeline_mode<synchronous>, transform_indices = @transform_5, window_bounds = array<i64: 1, 128>}, {transform_indices = @transform_6, window_bounds = array<i64: 8, 128>}]} {
    %c0 = arith.constant 0 : index
    %c0_0 = arith.constant 0 : index
    %0 = vector.load %arg1[%c0, %c0_0] : memref<8x64xf32, #tpu.memory_space<vmem>>, vector<8x64xf32>
    %1 = arith.truncf %0 : vector<8x64xf32> to vector<8x64xbf16>
    %c0_1 = arith.constant 0 : index
    %c0_2 = arith.constant 0 : index
    %2 = vector.load %arg2[%c0_1, %c0_2] : memref<64x128xbf16, #tpu.memory_space<vmem>>, vector<64x128xbf16>
    %cst = arith.constant dense<0.000000e+00> : vector<8x128xf32>
    %3 = tpu.matmul %1, %2, %cst {dimension_numbers = #tpu.dot_dimension_numbers<[1], [0], [0], [1], [0, 0, 1, 1], [], []>} : vector<8x64xbf16>, vector<64x128xbf16>, vector<8x128xf32> -> vector<8x128xf32>
    %c0_3 = arith.constant 0 : index
    %c0_4 = arith.constant 0 : index
    %4 = vector.load %arg3[%c0_3, %c0_4] : memref<1x128xf32, #tpu.memory_space<vmem>>, vector<1x128xf32>
    %5 = vector.broadcast %4 : vector<1x128xf32> to vector<8x128xf32>
    %6 = arith.addf %3, %5 : vector<8x128xf32>
    %c0_5 = arith.constant 0 : index
    %c0_6 = arith.constant 0 : index
    %7 = vector.load %arg4[%c0_5, %c0_6] : memref<8x128xf32, #tpu.memory_space<vmem>>, vector<8x128xf32>
    %8 = arith.addf %6, %7 : vector<8x128xf32>
    %cst_7 = arith.constant dense<0.000000e+00> : vector<8xf32>
    %9 = vector.multi_reduction <add>, %8, %cst_7 [1] : vector<8x128xf32> to vector<8xf32>
    %10 = vector.shape_cast %9 : vector<8xf32> to vector<8x1xf32>
    %11 = arith.mulf %8, %8 : vector<8x128xf32>
    %cst_8 = arith.constant dense<0.000000e+00> : vector<8xf32>
    %12 = vector.multi_reduction <add>, %11, %cst_8 [1] : vector<8x128xf32> to vector<8xf32>
    %13 = vector.shape_cast %12 : vector<8xf32> to vector<8x1xf32>
    %cst_9 = arith.constant 3.125000e-02 : f32
    %14 = vector.broadcast %cst_9 : f32 to vector<8x1xf32>
    %15 = arith.mulf %10, %14 : vector<8x1xf32>
    %cst_10 = arith.constant 3.125000e-02 : f32
    %16 = vector.broadcast %cst_10 : f32 to vector<8x1xf32>
    %17 = arith.mulf %13, %16 : vector<8x1xf32>
    %18 = arith.mulf %15, %15 : vector<8x1xf32>
    %19 = arith.subf %17, %18 : vector<8x1xf32>
    %cst_11 = arith.constant 0.000000e+00 : f32
    %20 = vector.broadcast %cst_11 : f32 to vector<8x1xf32>
    %21 = arith.maximumf %19, %20 : vector<8x1xf32>
    %cst_12 = arith.constant 9.99999996E-13 : f32
    %22 = vector.broadcast %cst_12 : f32 to vector<8x1xf32>
    %23 = arith.addf %21, %22 : vector<8x1xf32>
    %24 = math.rsqrt %23 : vector<8x1xf32>
    %cst_13 = arith.constant 0.000000e+00 : f32
    %25 = vector.broadcast %cst_13 : f32 to vector<8x1xf32>
    %26 = arith.subf %25, %15 : vector<8x1xf32>
    %27 = arith.mulf %26, %24 : vector<8x1xf32>
    %c0_14 = arith.constant 0 : index
    %c0_15 = arith.constant 0 : index
    %28 = vector.load %arg5[%c0_14, %c0_15] : memref<1x128xf32, #tpu.memory_space<vmem>>, vector<1x128xf32>
    %29 = vector.broadcast %24 : vector<8x1xf32> to vector<8x128xf32>
    %30 = arith.mulf %8, %29 : vector<8x128xf32>
    %31 = vector.broadcast %27 : vector<8x1xf32> to vector<8x128xf32>
    %32 = arith.addf %30, %31 : vector<8x128xf32>
    %33 = vector.broadcast %28 : vector<1x128xf32> to vector<8x128xf32>
    %34 = arith.mulf %33, %32 : vector<8x128xf32>
    %c0_16 = arith.constant 0 : index
    %c0_17 = arith.constant 0 : index
    %35 = vector.load %arg6[%c0_16, %c0_17] : memref<1x128xf32, #tpu.memory_space<vmem>>, vector<1x128xf32>
    %36 = vector.broadcast %35 : vector<1x128xf32> to vector<8x128xf32>
    %37 = arith.addf %34, %36 : vector<8x128xf32>
    %c0_18 = arith.constant 0 : index
    %c0_19 = arith.constant 0 : index
    %38 = vector.load %arg7[%c0_18, %c0_19] : memref<8x128xf32, #tpu.memory_space<vmem>>, vector<8x128xf32>
    tpu.vector_store %arg7[%c0_18, %c0_19], %37 {strides = array<i32>} : memref<8x128xf32, #tpu.memory_space<vmem>>, vector<8x128xf32>,
    return
  }
  func.func @transform_0(%arg0: i32) -> (i32, i32) {
    %c0_i32 = arith.constant 0 : i32
    %c0_i32_0 = arith.constant 0 : i32
    return %arg0, %c0_i32 : i32, i32
  }
  func.func @transform_1(%arg0: i32) -> (i32, i32) {
    %c0_i32 = arith.constant 0 : i32
    %c0_i32_0 = arith.constant 0 : i32
    %c0_i32_1 = arith.constant 0 : i32
    return %c0_i32, %c0_i32_0 : i32, i32
  }
  func.func @transform_2(%arg0: i32) -> (i32, i32) {
    %c0_i32 = arith.constant 0 : i32
    %c0_i32_0 = arith.constant 0 : i32
    %c0_i32_1 = arith.constant 0 : i32
    return %c0_i32, %c0_i32_0 : i32, i32
  }
  func.func @transform_3(%arg0: i32) -> (i32, i32) {
    %c0_i32 = arith.constant 0 : i32
    %c0_i32_0 = arith.constant 0 : i32
    return %arg0, %c0_i32 : i32, i32
  }
  func.func @transform_4(%arg0: i32) -> (i32, i32) {
    %c0_i32 = arith.constant 0 : i32
    %c0_i32_0 = arith.constant 0 : i32
    %c0_i32_1 = arith.constant 0 : i32
    return %c0_i32, %c0_i32_0 : i32, i32
  }
  func.func @transform_5(%arg0: i32) -> (i32, i32) {
    %c0_i32 = arith.constant 0 : i32
    %c0_i32_0 = arith.constant 0 : i32
    %c0_i32_1 = arith.constant 0 : i32
    return %c0_i32, %c0_i32_0 : i32, i32
  }
  func.func @transform_6(%arg0: i32) -> (i32, i32) {
    %c0_i32 = arith.constant 0 : i32
    %c0_i32_0 = arith.constant 0 : i32
    return %arg0, %c0_i32 : i32, i32
  }
}

</mosaic_0001>

<bundles_post_ra>
// kernel: _output_forward_impl.1
= control target key start
LH: loop header
LB: loop body
LE: loop exit
PB: predicated region body
PF: predicated region fallthrough
CT: control target
= control target key end

     0   :  { %11 = vsyncpa [#allocation3], 0  ;;  %s921_s0 = inlined_call_operand.hbm [shape: f32[16,64], index: 0, kind: input, shape index: {}]   ;;  %s922_s1 = inlined_call_operand.vmem [shape: bf16[64,128], index: 1, kind: input, shape index: {}]   ;;  %s923_s2 = inlined_call_operand.vmem [shape: f32[1,128], index: 2, kind: input, shape index: {}]   ;;  %s924_s3 = inlined_call_operand.vmem [shape: f32[16,128], index: 3, kind: input, shape index: {}]   ;;  %s925_s4 = inlined_call_operand.vmem [shape: f32[1,128], index: 4, kind: input, shape index: {}]   ;;  %s926_s5 = inlined_call_operand.vmem [shape: f32[1,128], index: 5, kind: input, shape index: {}]   ;;  %s927_s6 = inlined_call_operand.hbm [shape: f32[16,128], index: 6, kind: output, shape index: {}]  }
   0x1   :  { %13 = vsyncpa [#allocation3 + $0x1], 0 }
   0x2   :  { %14 = vsyncpa [#allocation4], 0 }
   0x3   :  { %16 = vsyncpa [#allocation4 + $0x1], 0  ;;  %s730_s21 = smov 0   ;;  %s732_s22 = smov 0  }
   0x4   :  { %s734_s23 = smov 0   ;;  %s736_s24 = smov 0  }
   0x5 LB: > { %s751_s25 = sadd.s32 4294967295, %s689_s24   ;;  %s501_s26 = sadd.s32 4294967294, %s689_s24   ;;  %s689_s24 = sphi %s736_s24, %s942_s24   ;;  %s685_s23 = sphi %s734_s23, %s941_s23   ;;  %s681_s22 = sphi %s732_s22, %s940_s22   ;;  %s677_s21 = sphi %s730_s21, %s939_s21  }
   0x6   : > { %s755_s27 = sadd.s32 1, %s689_s24   ;;  %s29_s28 = sadd.s32 1, %s685_s23 }
   0x7   : > { %s26_s29 = ssub.s32 %s689_s24, %s755_s27  ;;  %p36_p0 = scmp.ne.s32.totalorder %s685_s23, %s681_s22 }
   0x8   : > { %p27_p1 = scmp.eq.s32.totalorder %s26_s29, 0  ;;  %p37_p2 = scmp.eq.s32.totalorder %s689_s24, 0 }
   0x9   : > { %p42_p3 = scmp.ne.s32.totalorder %s681_s22, %s677_s21  ;;  %p43_p4 = scmp.eq.s32.totalorder %s751_s25, 0 }
   0xa   : > { %s767_s30 = scalar_select %p27_p1, %s685_s23, %s29_s28  }
   0xb   : > { %p769_p5 = por %p37_p2, %p36_p0  ;;  %p773_p6 = por %p43_p4, %p42_p3 }
   0xc   : > { %p176_p7 = scmp.eq.s32.totalorder %s751_s25, 1  ;;  %p182_p8 = scmp.eq.s32.totalorder %s501_s26, 1 }
   0xd   : > { %p551_p10 = scmp.lt.s32.totalorder %s689_s24, 2  ;;  %s214_s11 = sand.u32 1, %s685_s23  }
   0xe   : > { %p780_p11 = por %p176_p7, %p36_p0  ;;  %p784_p12 = por %p182_p8, %p42_p3 }
   0xf   : > { %s505_s12 = sshll.u32 %s689_s24, 7  ;;  %s504_s13 = sshll.u32 %s214_s11, 3 }
  0x10   : > { %s931_s9 = scalar_select %p780_p11, 1, 0 }
  0x11   : > { %s932_s10 = scalar_select %p784_p12, 1, 0 }
  0x12   : > { %s793_s16 = scalar_lea.hbm %s921_s0, %s505_s12  ;;  %s218_s17 = scalar_lea.vmem [#allocation2], %s504_s13 }
  0x13   : > { %s225_s18 = sshll.u32 %s218_s17, 4  ;;  %p797_p13 = pnand %p551_p10, %p769_p5  ;;  %s801_s18 = int_to_ptr.vmem [resolvable:$true] %s225_s18 }
  0x14   : > { %s215_s20 = scalar_lea.sflag [#allocation3], %s214_s11  ;;  %s593_s26 = scalar_lea.hbm %s793_s16, 128 }
  0x15   : > { %p594_p2 = scmp.ne.s32.totalorder %s793_s16, %s593_s26  ;;  %p595_p3 = pneg %p797_p13 }
  0x16   : > { %s598_s7 = scalar_lea.hbm %s921_s0, 256  ;;  %p599_p5 = scmp.lt.u32.totalorder %s793_s16, %s921_s0 }
  0x17   : > { %p596_p4 = pnand %p595_p3, %p594_p2  ;;  %p600_p8 = scmp.lt.u32.totalorder %s598_s7, %s593_s26 }
  0x18   : > { %p602_p9 = scmp.lt.u32.totalorder %s593_s26, %s793_s16 }
  0x19   : > { %p597_p7 = pneg %p596_p4  ;;  %p601_p10 = por %p600_p8, %p599_p5 }
  0x1b   : > { %p603_p0 = por %p602_p9, %p601_p10 }
  0x1d   : > { %p604_p1 = pnand %p603_p0, %p597_p7 }
  0x1f   : > { %607 = shalt.err (!%p604_p1)
}
  0x20   : > { %s608_s11 = scalar_lea.vmem %s801_s18, 128  ;;  %s691_s14 = smov [#allocation2]  }
  0x21   : > { %p609_p2 = scmp.ne.s32.totalorder %s801_s18, %s608_s11  ;;  %s613_s15 = sshll.u32 %s691_s14, 4  ;;  %s614_s15 = int_to_ptr.vmem [resolvable:$false] %s613_s15 }
  0x22   : > { %s615_s17 = scalar_lea.vmem %s614_s15, 256  ;;  %p616_p11 = scmp.lt.s32.totalorder %s801_s18, %s614_s15 }
  0x23   : > { %p611_p4 = pnand %p609_p2, %p595_p3  ;;  %p617_p5 = scmp.lt.s32.totalorder %s615_s17, %s608_s11 }
  0x25   : > { %p612_p12 = pneg %p611_p4  ;;  %p618_p8 = por %p617_p5, %p616_p11 }
  0x27   : > { %p619_p9 = pnand %p618_p8, %p612_p12 }
  0x29   : > { %622 = shalt.err (!%p619_p9)
}
  0x2a   : > { %546 = dma.hbm_to_vmem [thread:$0]  (!%p797_p13), %s793_s16, 128, %s801_s18, %s215_s20  }
  0x2b   : > { %p934_p0 = scmp.lt.s32.totalorder %s689_s24, 3  ;;  %p935_p1 = scmp.ge.s32.totalorder %s689_s24, 1 }
  0x2d   : > { %p238_p3 = pnand %p935_p1, %p934_p0 }
  0x2e   : > { %s835_s26 = sand.u32 (!%p238_p3), 1, %s681_s22  }
  0x2f   : > { %241 = sbr.rel (%p238_p3) target bundleno = 475 (0x1db), region = 44  ;;  %s507_s28 = sshll.u32 (!%p238_p3), %s835_s26, 3 }
  0x30   : > { %s244_s29 = scalar_lea.sflag (!%p238_p3), [#allocation3], %s835_s26  ;;  %s247_s19 = scalar_lea.vmem (!%p238_p3), [#allocation2], %s507_s28 }
  0x36   : > { %668 = dma.done.wait (%p773_p6), %s244_s29, 128  }
  0x37   : > { %670 = vsyncadd (%p773_p6), %s244_s29, 4294967168  ;;  %v692_v0 = vmov 0.0   ;;  %vm693_vm0 = vmmov 0   ;;  %v587_v1 = vld [vmem:[%s922_s1] sm:$0xff]   ;;  %v588_v2 = vld [vmem:[%s922_s1 + $0x8] sm:$0xff]   ;;  %vm326_vm1 = vcmask 523264  }
  0x38   : > { %527 = vmatprep.subr.bf16.mxu0 %v692_v0  ;;  %535 = vmatprep.mubr.msk.bf16.mxu0 %vm693_vm0, %v692_v0  ;;  %v589_v3 = vld [vmem:[%s922_s1 + $0x10] sm:$0xff]   ;;  %v590_v4 = vld [vmem:[%s922_s1 + $0x18] sm:$0xff]   ;;  %v285_v5 = vld [vmem:[%s247_s19] sm:$0xff]  ;;  %p280_p6 = scmp.lt.s32.totalorder %s751_s25, 1  ;;  %s519_s13 = sshll.u32 %s751_s25, 7 }
  0x39   : > { %528 = vmatpush3.bf16.msra.mxu0 %v587_v1  ;;  %v286_v6 = vpack.c.bf16 %v285_v5, %v285_v5  ;;  %v510_v7 = vld [vmem:[%s923_s2] ss:$0 sm:$0xff]  ;;  %s279_s11 = scalar_lea.vmem [#allocation5], %s507_s28  ;;  %s877_s29 = scalar_lea.hbm %s927_s6, %s519_s13 }
  0x3a   : > { %529 = vmatprep.subr.bf16.mxu0 %v692_v0  ;;  %s281_s14 = scalar_select %p280_p6, %s751_s25, 1  ;;  %v516_v28 = vld [vmem:[%s925_s4] ss:$0 sm:$0xff] }
  0x3b   : > { %v517_v30 = vld [vmem:[%s926_s5] ss:$0 sm:$0xff]  ;;  %p936_p12 = scmp.ne.s32.totalorder %s931_s9, 0  ;;  %s694_s25 = smov [#allocation5]  }
  0x3c   : > { %s509_s15 = sshll.u32 %s281_s14, 3  ;;  %s419_s14 = sshll.u32 %s279_s11, 4  ;;  %s879_s14 = int_to_ptr.vmem [resolvable:$true] %s419_s14 }
  0x3d   : > { %530 = vmatpush3.bf16.msra.mxu0 %v588_v2  ;;  %s283_s16 = scalar_lea.vmem %s924_s3, %s509_s15  ;;  %s623_s18 = scalar_lea.vmem %s879_s14, 128 }
  0x3e   : > { %531 = vmatprep.subr.bf16.mxu0 %v692_v0  ;;  %v370_v9 = vld [vmem:[%s283_s16] sm:$0xff]  ;;  %s406_s16 = scalar_lea.sflag [#allocation4], %s835_s26  ;;  %p624_p11 = scmp.ne.s32.totalorder %s879_s14, %s623_s18 }
  0x3f   : > { %s627_s28 = sshll.u32 %s694_s25, 4  ;;  %s628_s28 = int_to_ptr.vmem [resolvable:$false] %s627_s28 }
  0x40   : > { %p625_p13 = pnand %p624_p11, %p936_p12  ;;  %s629_s20 = scalar_lea.vmem %s628_s28, 256 }
  0x41   : > { %532 = vmatpush3.bf16.msra.mxu0 %v589_v3  ;;  %p630_p10 = scmp.lt.s32.totalorder %s879_s14, %s628_s28  ;;  %p631_p2 = scmp.lt.s32.totalorder %s629_s20, %s623_s18 }
  0x42   : > { %533 = vmatprep.subr.bf16.mxu0 %v692_v0  ;;  %p626_p7 = pneg %p625_p13 }
  0x43   : > { %p632_p4 = por %p631_p2, %p630_p10 }
  0x45   : > { %534 = vmatpush3.bf16.msra.mxu0 %v590_v4  ;;  %p633_p5 = pnand %p632_p4, %p626_p7 }
  0x48   : > { %536 = vmatmul.mubr.msk.bf16.vlgmr.msra.gmra.mrb[0].mxu0 %vm326_vm1, %v286_v6 }
 0x11b   : > { %v364_v8 = vpop.f32.mrb[0].mxu0 }
 0x11c   : > { %v365_v10 = vadd.f32 %v510_v7, %v364_v8  ;;  %v537_v11 = vpop.f32.mrb[1].mxu0 }
 0x11d   : > { %v367_v12 = vpop.f32.mrb[2].mxu0 }
 0x11e   : > { %v371_v13 = vadd.f32 %v370_v9, %v365_v10  ;;  %v538_v14 = vpop.f32.mrb[3].mxu0 }
 0x120   : > { %372 = vadd.xlane.f32.xlu0 %v371_v13  ;;  %v374_v15 = vmul.f32 %v371_v13, %v371_v13 }
 0x124   : > { %375 = vadd.xlane.f32.xlu0 %v374_v15 }
 0x1ad   : > { %v373_v16 = vpop.xlane.xlu0 %372 }
 0x1ae   : > { %v377_v17 = vmul.f32 0.03125, %v373_v16 }
 0x1b0   : > { %v379_v19 = vmul.f32 %v377_v17, %v377_v17  ;;  %v384_v24 = vsub.f32 0.0, %v377_v17 }
 0x1b1   : > { %v376_v18 = vpop.xlane.xlu0 %375 }
 0x1b2   : > { %v378_v20 = vmul.f32 0.03125, %v376_v18 }
 0x1b4   : > { %v380_v21 = vsub.f32 %v378_v20, %v379_v19 }
 0x1b6   : > { %v381_v22 = vmax.f32 %v380_v21, 0.0 }
 0x1b8   : > { %v382_v23 = vadd.f32 1e-12, %v381_v22 }
 0x1ba   : > { %591 = vrsqrt.f32 %v382_v23 }
 0x1c4   : > { %v592_v25 = vpop.eup %591 }
 0x1c5   : > { %v385_v26 = vmul.f32 %v592_v25, %v384_v24  ;;  %v387_v27 = vmul.f32 %v592_v25, %v371_v13 }
 0x1c7   : > { %v388_v29 = vadd.f32 %v387_v27, %v385_v26 }
 0x1c9   : > { %v395_v31 = vmul.f32 %v516_v28, %v388_v29 }
 0x1cb   : > { %v403_v32 = vadd.f32 %v517_v30, %v395_v31 }
 0x1cd   : > { %404 = vst [vmem:[%s279_s11] sm:$0xff] %v403_v32 }
 0x1ce   : > { %636 = shalt.err (!%p633_p5)
}
 0x1cf   : > { %s637_s26 = scalar_lea.hbm %s877_s29, 128  ;;  %s641_s12 = scalar_lea.hbm %s927_s6, 256 }
 0x1d0   : > { %p638_p8 = scmp.ne.s32.totalorder %s877_s29, %s637_s26  ;;  %p642_p1 = scmp.lt.u32.totalorder %s877_s29, %s927_s6 }
 0x1d1   : > { %p643_p3 = scmp.lt.u32.totalorder %s641_s12, %s637_s26  ;;  %p645_p11 = scmp.lt.u32.totalorder %s637_s26, %s877_s29 }
 0x1d2   : > { %p639_p9 = pnand %p638_p8, %p936_p12 }
 0x1d3   : > { %p644_p6 = por %p643_p3, %p642_p1 }
 0x1d4   : > { %p640_p0 = pneg %p639_p9 }
 0x1d5   : > { %p646_p13 = por %p645_p11, %p644_p6 }
 0x1d7   : > { %p647_p7 = pnand %p646_p13, %p640_p0 }
 0x1d9   : > { %650 = shalt.err (!%p647_p7)
}
 0x1da   : > { %541 = dma.vmem_to_hbm [thread:$0]  (%p936_p12), %s879_s14, 128, %s877_s29, %s406_s16  }
 0x1db PF: > { %s431_s11 = sand.u32 1, %s677_s21   ;;  %p937_p10 = scmp.ne.s32.totalorder %s932_s10, 0 }
 0x1dc   : > { %p938_p2 = scmp.ge.s32.totalorder %s689_s24, 2  ;;  %s432_s15 = scalar_lea.sflag [#allocation4], %s431_s11 }
 0x1de   : > { %p548_p4 = pnand %p938_p2, %p937_p10 }
 0x1e0   : > { %672 = dma.done.wait (!%p548_p4), %s432_s15, 128  }
 0x1e1   : > { %674 = vsyncadd (!%p548_p4), %s432_s15, 4294967168  ;;  %p19_p5 = scmp.ge.s32.totalorder %s755_s27, 4   ;;  %s939_s21 = smov %s681_s22 }
 0x1e2   : > { %s940_s22 = smov %s685_s23  ;;  %s941_s23 = smov %s767_s30 }
 0x1e3   : > { %s942_s24 = smov %s755_s27  ;;  %21 = sbr.rel (!%p19_p5) target bundleno = 5 (0x5), region = 92 }
 0x1ea   :  { %437 = vsyncpa [#allocation3], 1 }
 0x1eb   :  { %439 = vsyncpa [#allocation3 + $0x1], 1 }
 0x1ec   :  { %440 = vsyncpa [#allocation4], 1 }
 0x1ed   :  { %442 = vsyncpa [#allocation4 + $0x1], 1 }

</bundles_post_ra>
